<compile_context>
chip_gen: v7x
topology: tpu7x:2x2x1
jax: 0.10.0
libtpu: 0.0.40
codegen_flags: <defaults>
</compile_context>

<pallas_src>
import jax
import jax.numpy as jnp
import numpy as np
from jax import lax
from jax.experimental import pallas as pl
from jax.experimental.pallas import tpu as pltpu


def _lstm_fc_kernel(x2d_ref, wih0w_ref, wwave_ref, bwave_ref,
                    wfc_ref, bfc_ref, out_ref):
    """Wavefront 2-layer LSTM + final Linear on the last top-layer hidden state.

    x2d_ref   : ((T+1)*B, D)  time-major flattened input, one zero step appended.
    wih0w_ref : (D, 8H)   layer-0 input weights in interleaved gate layout
                          [i0|i1|f0|f1|g0|g1|o0|o1] (layer-1 columns are zero).
    wwave_ref : (2H, 8H)  fused per-wave weights: rows [0:H] = h0 -> (whh0, wih1),
                          rows [H:2H] = h1 -> whh1, same interleaved columns.
    bwave_ref : (1, 8H)   fused biases (b0 | b1) interleaved.
    wfc_ref   : (H, C), bfc_ref: (1, C), out_ref: (B, C).
    PyTorch gate order (i, f, g, o); g is the tanh gate.
    """
    B = out_ref.shape[0]
    H = wwave_ref.shape[0] // 2
    T = x2d_ref.shape[0] // B - 1          # last row-block is the bias-only step

    # ---- Loop-invariant loads, hoisted. ----
    wwave = wwave_ref[...]                                  # (2H, 8H)
    wfc = wfc_ref[...]                                      # (H, C)
    bfc = bfc_ref[...]                                      # (1, C)

    # ---- One MXU call: layer-0 input projection of ALL steps (+ biases). ----
    gates_in = (jnp.dot(x2d_ref[...], wih0w_ref[...],
                        preferred_element_type=jnp.float32)
                + bwave_ref[...])                           # ((T+1)*B, 8H)

    # Lane masks (built once). tanh gates g0|g1 sit in lanes [4H, 6H).
    lane8 = lax.broadcasted_iota(jnp.int32, (B, 8 * H), 1)
    g_mask = (lane8 >= 4 * H) & (lane8 < 6 * H)
    lane2 = lax.broadcasted_iota(jnp.int32, (B, 2 * H), 1)
    l0_mask = (lane2 < H).astype(jnp.float32)               # layer-0 half of state

    # Packed wavefront state: lanes [0:H] = layer 0, lanes [H:2H] = layer 1.
    state_h = jnp.zeros((B, 2 * H), jnp.float32)
    state_c = jnp.zeros((B, 2 * H), jnp.float32)

    # Wave w evaluates layer-0 step w and layer-1 step w-1 in parallel:
    # one (B,2H)@(2H,8H) MXU call + one full-width activation per wave.
    for w in range(T + 1):
        gates = (jnp.dot(state_h, wwave, preferred_element_type=jnp.float32)
                 + gates_in[w * B:(w + 1) * B, :])          # (B, 8H)
        acts = jnp.where(g_mask, jnp.tanh(gates), jax.nn.sigmoid(gates))
        i_p = acts[:, 0 * H:2 * H]                          # [i0 | i1]
        f_p = acts[:, 2 * H:4 * H]                          # [f0 | f1]
        g_p = acts[:, 4 * H:6 * H]                          # [g0 | g1]
        o_p = acts[:, 6 * H:8 * H]                          # [o0 | o1]
        state_c = f_p * state_c + i_p * g_p
        state_h = o_p * jnp.tanh(state_c)
        if w == 0:
            # Wave 0's layer-1 half corresponds to the nonexistent step -1;
            # zero it so wave 1 sees h1_{-1} = c1_{-1} = 0.
            state_h = state_h * l0_mask
            state_c = state_c * l0_mask

    # After wave T the packed state is [h0_T (discarded), h1_{T-1}].
    h1_last = state_h[:, H:2 * H]
    out_ref[...] = (jnp.dot(h1_last, wfc, preferred_element_type=jnp.float32)
                    + bfc).astype(out_ref.dtype)


def video_classifier_forward(x, params):
    """x: (B, T, D) float32 (batch_first, like PyTorch). Returns (B, num_classes)."""
    B, T, D = x.shape
    H = params["whh0_T"].shape[0]
    C = params["wfc_T"].shape[1]

    # ---- Host-side layout plumbing (one-time, outside the kernel). ----
    # Time-major flattened input, plus one zero "step": wave T's addend row is
    # then just the fused bias (its layer-0 half is discarded anyway).
    x_tm = jnp.transpose(x, (1, 0, 2)).reshape(T * B, D)
    x2d_ext = jnp.concatenate([x_tm, jnp.zeros((B, D), x.dtype)], axis=0)

    # Interleaved wavefront gate layout: [i0|i1|f0|f1|g0|g1|o0|o1], H lanes each.
    def interleave(w_l0, w_l1):
        rows = w_l0.shape[0]
        out = jnp.zeros((rows, 8 * H), jnp.float32)
        for g in range(4):
            out = out.at[:, (2 * g) * H:(2 * g + 1) * H].set(w_l0[:, g * H:(g + 1) * H])
            out = out.at[:, (2 * g + 1) * H:(2 * g + 2) * H].set(w_l1[:, g * H:(g + 1) * H])
        return out

    # Layer-0 input projection columns only (layer-1 columns zero).
    wih0_wave = interleave(params["wih0_T"], jnp.zeros((D, 4 * H), jnp.float32))
    # Fused per-wave recurrent/feed weights:
    #   rows [0:H]  (h0):  whh0 -> layer-0 gates,  wih1 -> layer-1 gates
    #   rows [H:2H] (h1):  0    -> layer-0 gates,  whh1 -> layer-1 gates
    w_wave = jnp.concatenate(
        [interleave(params["whh0_T"], params["wih1_T"]),
         interleave(jnp.zeros((H, 4 * H), jnp.float32), params["whh1_T"])],
        axis=0)
    b_wave = interleave(params["b0"], params["b1"])

    vmem = pl.BlockSpec(memory_space=pltpu.MemorySpace.VMEM)
    return pl.pallas_call(
        _lstm_fc_kernel,
        out_shape=jax.ShapeDtypeStruct((B, C), jnp.float32),
        in_specs=[vmem] * 6,
        out_specs=vmem,
    )(x2d_ext, wih0_wave, w_wave, b_wave, params["wfc_T"], params["bfc"])


def _ref_forward(x, params):
    """Pure-JAX reference (same math, lax.scan) for correctness checking."""
    B, T, D = x.shape
    H = params["whh0_T"].shape[0]

    def cell(x_t, h_prev, c_prev, wih_T, whh_T, b):
        gates = x_t @ wih_T + h_prev @ whh_T + b
        i = jax.nn.sigmoid(gates[:, 0 * H:1 * H])
        f = jax.nn.sigmoid(gates[:, 1 * H:2 * H])
        g = jnp.tanh(gates[:, 2 * H:3 * H])
        o = jax.nn.sigmoid(gates[:, 3 * H:4 * H])
        c = f * c_prev + i * g
        h = o * jnp.tanh(c)
        return h, c

    def step(carry, x_t):
        h0, c0, h1, c1 = carry
        h0, c0 = cell(x_t, h0, c0, params["wih0_T"], params["whh0_T"], params["b0"])
        h1, c1 = cell(h0, h1, c1, params["wih1_T"], params["whh1_T"], params["b1"])
        return (h0, c0, h1, c1), None

    zeros = jnp.zeros((B, H), jnp.float32)
    (h0, c0, h1, c1), _ = lax.scan(step, (zeros, zeros, zeros, zeros),
                                   jnp.transpose(x, (1, 0, 2)))
    return h1 @ params["wfc_T"] + params["bfc"]


def init_params(key, input_dim=63, hidden_dim=16, num_classes=2):
    """PyTorch-style uniform(-1/sqrt(H), 1/sqrt(H)) init.

    PyTorch's LSTM has separate b_ih and b_hh per layer; they only ever appear
    summed in the cell, so we fold them into one bias (drawn as the sum of two
    uniforms to keep the parameter distribution faithful).  All weights are
    stored pre-transposed for `act @ W` matmuls in the kernel.
    """
    k = 1.0 / np.sqrt(hidden_dim)
    keys = jax.random.split(key, 10)
    u = lambda kk, shape: jax.random.uniform(kk, shape, jnp.float32, -k, k)
    return {
        "wih0_T": u(keys[0], (input_dim, 4 * hidden_dim)),
        "whh0_T": u(keys[1], (hidden_dim, 4 * hidden_dim)),
        "b0":     u(keys[2], (1, 4 * hidden_dim)) + u(keys[3], (1, 4 * hidden_dim)),
        "wih1_T": u(keys[4], (hidden_dim, 4 * hidden_dim)),
        "whh1_T": u(keys[5], (hidden_dim, 4 * hidden_dim)),
        "b1":     u(keys[6], (1, 4 * hidden_dim)) + u(keys[7], (1, 4 * hidden_dim)),
        "wfc_T":  u(keys[8], (hidden_dim, num_classes)),
        "bfc":    u(keys[9], (1, num_classes)),
    }


if __name__ == "__main__":
    B, T, D, H, C = 2, 8, 63, 16, 2

    root = jax.random.PRNGKey(0)
    k_x, k_p = jax.random.split(root)
    x = jax.random.normal(k_x, (B, T, D), jnp.float32)
    params = init_params(k_p, input_dim=D, hidden_dim=H, num_classes=C)

    out = video_classifier_forward(x, params)
    out = jax.block_until_ready(out)

    ref = _ref_forward(x, params)
    np.testing.assert_allclose(np.asarray(out), np.asarray(ref), atol=1e-3, rtol=1e-3)

    print("KERNEL_OK")
</pallas_src>

<mosaic_0001>
module attributes {stable_mosaic.version = 11 : i64} {
  func.func @_lstm_fc_kernel(%arg0: memref<18x63xf32, #tpu.memory_space<vmem>>, %arg1: memref<63x128xf32, #tpu.memory_space<vmem>>, %arg2: memref<32x128xf32, #tpu.memory_space<vmem>>, %arg3: memref<1x128xf32, #tpu.memory_space<vmem>>, %arg4: memref<16x2xf32, #tpu.memory_space<vmem>>, %arg5: memref<1x2xf32, #tpu.memory_space<vmem>>, %arg6: memref<2x2xf32, #tpu.memory_space<vmem>>) attributes {dimension_semantics = [], scalar_prefetch = 0 : i64, scratch_operands = 0 : i64, tpu.core_type = #tpu.core_type<tc>} {
    %c0 = arith.constant 0 : index
    %c0_0 = arith.constant 0 : index
    %0 = vector.load %arg2[%c0, %c0_0] : memref<32x128xf32, #tpu.memory_space<vmem>>, vector<32x128xf32>
    %c0_1 = arith.constant 0 : index
    %c0_2 = arith.constant 0 : index
    %1 = vector.load %arg4[%c0_1, %c0_2] : memref<16x2xf32, #tpu.memory_space<vmem>>, vector<16x2xf32>
    %c0_3 = arith.constant 0 : index
    %c0_4 = arith.constant 0 : index
    %2 = vector.load %arg5[%c0_3, %c0_4] : memref<1x2xf32, #tpu.memory_space<vmem>>, vector<1x2xf32>
    %c0_5 = arith.constant 0 : index
    %c0_6 = arith.constant 0 : index
    %3 = vector.load %arg0[%c0_5, %c0_6] : memref<18x63xf32, #tpu.memory_space<vmem>>, vector<18x63xf32>
    %c0_7 = arith.constant 0 : index
    %c0_8 = arith.constant 0 : index
    %4 = vector.load %arg1[%c0_7, %c0_8] : memref<63x128xf32, #tpu.memory_space<vmem>>, vector<63x128xf32>
    %cst = arith.constant dense<0.000000e+00> : vector<18x128xf32>
    %5 = tpu.matmul %3, %4, %cst {dimension_numbers = #tpu.dot_dimension_numbers<[1], [0], [0], [1], [0, 0, 1, 1], [], []>} : vector<18x63xf32>, vector<63x128xf32>, vector<18x128xf32> -> vector<18x128xf32>
    %c0_9 = arith.constant 0 : index
    %c0_10 = arith.constant 0 : index
    %6 = vector.load %arg3[%c0_9, %c0_10] : memref<1x128xf32, #tpu.memory_space<vmem>>, vector<1x128xf32>
    %7 = vector.broadcast %6 : vector<1x128xf32> to vector<18x128xf32>
    %8 = arith.addf %5, %7 : vector<18x128xf32>
    %9 = tpu.iota {dimensions = array<i32: 1>} : vector<2x128xi32>
    %c64_i32 = arith.constant 64 : i32
    %10 = vector.broadcast %c64_i32 : i32 to vector<2x128xi32>
    %11 = arith.cmpi sge, %9, %10 : vector<2x128xi32>
    %c96_i32 = arith.constant 96 : i32
    %12 = vector.broadcast %c96_i32 : i32 to vector<2x128xi32>
    %13 = arith.cmpi slt, %9, %12 : vector<2x128xi32>
    %14 = arith.andi %11, %13 : vector<2x128xi1>
    %15 = tpu.iota {dimensions = array<i32: 1>} : vector<2x32xi32>
    %c16_i32 = arith.constant 16 : i32
    %16 = vector.broadcast %c16_i32 : i32 to vector<2x32xi32>
    %17 = arith.cmpi slt, %15, %16 : vector<2x32xi32>
    %18 = arith.extui %17 : vector<2x32xi1> to vector<2x32xi32>
    %19 = arith.sitofp %18 : vector<2x32xi32> to vector<2x32xf32>
    %cst_11 = arith.constant 0.000000e+00 : f32
    %20 = vector.broadcast %cst_11 : f32 to vector<2x32xf32>
    %cst_12 = arith.constant 0.000000e+00 : f32
    %21 = vector.broadcast %cst_12 : f32 to vector<2x32xf32>
    %cst_13 = arith.constant dense<0.000000e+00> : vector<2x128xf32>
    %22 = tpu.matmul %20, %0, %cst_13 {dimension_numbers = #tpu.dot_dimension_numbers<[1], [0], [0], [1], [0, 0, 1, 1], [], []>} : vector<2x32xf32>, vector<32x128xf32>, vector<2x128xf32> -> vector<2x128xf32>
    %23 = vector.extract_strided_slice %8 {offsets = [0, 0], sizes = [2, 128], strides = [1, 1]} : vector<18x128xf32> to vector<2x128xf32>
    %24 = arith.addf %22, %23 : vector<2x128xf32>
    %25 = math.tanh %24 : vector<2x128xf32>
    %26 = arith.negf %24 : vector<2x128xf32>
    %27 = math.exp %26 : vector<2x128xf32>
    %cst_14 = arith.constant 1.000000e+00 : f32
    %28 = vector.broadcast %cst_14 : f32 to vector<2x128xf32>
    %29 = arith.addf %28, %27 : vector<2x128xf32>
    %30 = arith.divf %28, %29 : vector<2x128xf32>
    %31 = arith.select %14, %25, %30 : vector<2x128xi1>, vector<2x128xf32>
    %32 = vector.extract_strided_slice %31 {offsets = [0, 0], sizes = [2, 32], strides = [1, 1]} : vector<2x128xf32> to vector<2x32xf32>
    %33 = vector.extract_strided_slice %31 {offsets = [0, 32], sizes = [2, 32], strides = [1, 1]} : vector<2x128xf32> to vector<2x32xf32>
    %34 = vector.extract_strided_slice %31 {offsets = [0, 64], sizes = [2, 32], strides = [1, 1]} : vector<2x128xf32> to vector<2x32xf32>
    %35 = vector.extract_strided_slice %31 {offsets = [0, 96], sizes = [2, 32], strides = [1, 1]} : vector<2x128xf32> to vector<2x32xf32>
    %36 = arith.mulf %33, %21 : vector<2x32xf32>
    %37 = arith.mulf %32, %34 : vector<2x32xf32>
    %38 = arith.addf %36, %37 : vector<2x32xf32>
    %39 = math.tanh %38 : vector<2x32xf32>
    %40 = arith.mulf %35, %39 : vector<2x32xf32>
    %41 = arith.mulf %40, %19 : vector<2x32xf32>
    %42 = arith.mulf %38, %19 : vector<2x32xf32>
    %cst_15 = arith.constant dense<0.000000e+00> : vector<2x128xf32>
    %43 = tpu.matmul %41, %0, %cst_15 {dimension_numbers = #tpu.dot_dimension_numbers<[1], [0], [0], [1], [0, 0, 1, 1], [], []>} : vector<2x32xf32>, vector<32x128xf32>, vector<2x128xf32> -> vector<2x128xf32>
    %44 = vector.extract_strided_slice %8 {offsets = [2, 0], sizes = [2, 128], strides = [1, 1]} : vector<18x128xf32> to vector<2x128xf32>
    %45 = arith.addf %43, %44 : vector<2x128xf32>
    %46 = math.tanh %45 : vector<2x128xf32>
    %47 = arith.negf %45 : vector<2x128xf32>
    %48 = math.exp %47 : vector<2x128xf32>
    %cst_16 = arith.constant 1.000000e+00 : f32
    %49 = vector.broadcast %cst_16 : f32 to vector<2x128xf32>
    %50 = arith.addf %49, %48 : vector<2x128xf32>
    %51 = arith.divf %49, %50 : vector<2x128xf32>
    %52 = arith.select %14, %46, %51 : vector<2x128xi1>, vector<2x128xf32>
    %53 = vector.extract_strided_slice %52 {offsets = [0, 0], sizes = [2, 32], strides = [1, 1]} : vector<2x128xf32> to vector<2x32xf32>
    %54 = vector.extract_strided_slice %52 {offsets = [0, 32], sizes = [2, 32], strides = [1, 1]} : vector<2x128xf32> to vector<2x32xf32>
    %55 = vector.extract_strided_slice %52 {offsets = [0, 64], sizes = [2, 32], strides = [1, 1]} : vector<2x128xf32> to vector<2x32xf32>
    %56 = vector.extract_strided_slice %52 {offsets = [0, 96], sizes = [2, 32], strides = [1, 1]} : vector<2x128xf32> to vector<2x32xf32>
    %57 = arith.mulf %54, %42 : vector<2x32xf32>
    %58 = arith.mulf %53, %55 : vector<2x32xf32>
    %59 = arith.addf %57, %58 : vector<2x32xf32>
    %60 = math.tanh %59 : vector<2x32xf32>
    %61 = arith.mulf %56, %60 : vector<2x32xf32>
    %cst_17 = arith.constant dense<0.000000e+00> : vector<2x128xf32>
    %62 = tpu.matmul %61, %0, %cst_17 {dimension_numbers = #tpu.dot_dimension_numbers<[1], [0], [0], [1], [0, 0, 1, 1], [], []>} : vector<2x32xf32>, vector<32x128xf32>, vector<2x128xf32> -> vector<2x128xf32>
    %63 = vector.extract_strided_slice %8 {offsets = [4, 0], sizes = [2, 128], strides = [1, 1]} : vector<18x128xf32> to vector<2x128xf32>
    %64 = arith.addf %62, %63 : vector<2x128xf32>
    %65 = math.tanh %64 : vector<2x128xf32>
    %66 = arith.negf %64 : vector<2x128xf32>
    %67 = math.exp %66 : vector<2x128xf32>
    %cst_18 = arith.constant 1.000000e+00 : f32
    %68 = vector.broadcast %cst_18 : f32 to vector<2x128xf32>
    %69 = arith.addf %68, %67 : vector<2x128xf32>
    %70 = arith.divf %68, %69 : vector<2x128xf32>
    %71 = arith.select %14, %65, %70 : vector<2x128xi1>, vector<2x128xf32>
    %72 = vector.extract_strided_slice %71 {offsets = [0, 0], sizes = [2, 32], strides = [1, 1]} : vector<2x128xf32> to vector<2x32xf32>
    %73 = vector.extract_strided_slice %71 {offsets = [0, 32], sizes = [2, 32], strides = [1, 1]} : vector<2x128xf32> to vector<2x32xf32>
    %74 = vector.extract_strided_slice %71 {offsets = [0, 64], sizes = [2, 32], strides = [1, 1]} : vector<2x128xf32> to vector<2x32xf32>
    %75 = vector.extract_strided_slice %71 {offsets = [0, 96], sizes = [2, 32], strides = [1, 1]} : vector<2x128xf32> to vector<2x32xf32>
    %76 = arith.mulf %73, %59 : vector<2x32xf32>
    %77 = arith.mulf %72, %74 : vector<2x32xf32>
    %78 = arith.addf %76, %77 : vector<2x32xf32>
    %79 = math.tanh %78 : vector<2x32xf32>
    %80 = arith.mulf %75, %79 : vector<2x32xf32>
    %cst_19 = arith.constant dense<0.000000e+00> : vector<2x128xf32>
    %81 = tpu.matmul %80, %0, %cst_19 {dimension_numbers = #tpu.dot_dimension_numbers<[1], [0], [0], [1], [0, 0, 1, 1], [], []>} : vector<2x32xf32>, vector<32x128xf32>, vector<2x128xf32> -> vector<2x128xf32>
    %82 = vector.extract_strided_slice %8 {offsets = [6, 0], sizes = [2, 128], strides = [1, 1]} : vector<18x128xf32> to vector<2x128xf32>
    %83 = arith.addf %81, %82 : vector<2x128xf32>
    %84 = math.tanh %83 : vector<2x128xf32>
    %85 = arith.negf %83 : vector<2x128xf32>
    %86 = math.exp %85 : vector<2x128xf32>
    %cst_20 = arith.constant 1.000000e+00 : f32
    %87 = vector.broadcast %cst_20 : f32 to vector<2x128xf32>
    %88 = arith.addf %87, %86 : vector<2x128xf32>
    %89 = arith.divf %87, %88 : vector<2x128xf32>
    %90 = arith.select %14, %84, %89 : vector<2x128xi1>, vector<2x128xf32>
    %91 = vector.extract_strided_slice %90 {offsets = [0, 0], sizes = [2, 32], strides = [1, 1]} : vector<2x128xf32> to vector<2x32xf32>
    %92 = vector.extract_strided_slice %90 {offsets = [0, 32], sizes = [2, 32], strides = [1, 1]} : vector<2x128xf32> to vector<2x32xf32>
    %93 = vector.extract_strided_slice %90 {offsets = [0, 64], sizes = [2, 32], strides = [1, 1]} : vector<2x128xf32> to vector<2x32xf32>
    %94 = vector.extract_strided_slice %90 {offsets = [0, 96], sizes = [2, 32], strides = [1, 1]} : vector<2x128xf32> to vector<2x32xf32>
    %95 = arith.mulf %92, %78 : vector<2x32xf32>
    %96 = arith.mulf %91, %93 : vector<2x32xf32>
    %97 = arith.addf %95, %96 : vector<2x32xf32>
    %98 = math.tanh %97 : vector<2x32xf32>
    %99 = arith.mulf %94, %98 : vector<2x32xf32>
    %cst_21 = arith.constant dense<0.000000e+00> : vector<2x128xf32>
    %100 = tpu.matmul %99, %0, %cst_21 {dimension_numbers = #tpu.dot_dimension_numbers<[1], [0], [0], [1], [0, 0, 1, 1], [], []>} : vector<2x32xf32>, vector<32x128xf32>, vector<2x128xf32> -> vector<2x128xf32>
    %101 = vector.extract_strided_slice %8 {offsets = [8, 0], sizes = [2, 128], strides = [1, 1]} : vector<18x128xf32> to vector<2x128xf32>
    %102 = arith.addf %100, %101 : vector<2x128xf32>
    %103 = math.tanh %102 : vector<2x128xf32>
    %104 = arith.negf %102 : vector<2x128xf32>
    %105 = math.exp %104 : vector<2x128xf32>
    %cst_22 = arith.constant 1.000000e+00 : f32
    %106 = vector.broadcast %cst_22 : f32 to vector<2x128xf32>
    %107 = arith.addf %106, %105 : vector<2x128xf32>
    %108 = arith.divf %106, %107 : vector<2x128xf32>
    %109 = arith.select %14, %103, %108 : vector<2x128xi1>, vector<2x128xf32>
    %110 = vector.extract_strided_slice %109 {offsets = [0, 0], sizes = [2, 32], strides = [1, 1]} : vector<2x128xf32> to vector<2x32xf32>
    %111 = vector.extract_strided_slice %109 {offsets = [0, 32], sizes = [2, 32], strides = [1, 1]} : vector<2x128xf32> to vector<2x32xf32>
    %112 = vector.extract_strided_slice %109 {offsets = [0, 64], sizes = [2, 32], strides = [1, 1]} : vector<2x128xf32> to vector<2x32xf32>
    %113 = vector.extract_strided_slice %109 {offsets = [0, 96], sizes = [2, 32], strides = [1, 1]} : vector<2x128xf32> to vector<2x32xf32>
    %114 = arith.mulf %111, %97 : vector<2x32xf32>
    %115 = arith.mulf %110, %112 : vector<2x32xf32>
    %116 = arith.addf %114, %115 : vector<2x32xf32>
    %117 = math.tanh %116 : vector<2x32xf32>
    %118 = arith.mulf %113, %117 : vector<2x32xf32>
    %cst_23 = arith.constant dense<0.000000e+00> : vector<2x128xf32>
    %119 = tpu.matmul %118, %0, %cst_23 {dimension_numbers = #tpu.dot_dimension_numbers<[1], [0], [0], [1], [0, 0, 1, 1], [], []>} : vector<2x32xf32>, vector<32x128xf32>, vector<2x128xf32> -> vector<2x128xf32>
    %120 = vector.extract_strided_slice %8 {offsets = [10, 0], sizes = [2, 128], strides = [1, 1]} : vector<18x128xf32> to vector<2x128xf32>
    %121 = arith.addf %119, %120 : vector<2x128xf32>
    %122 = math.tanh %121 : vector<2x128xf32>
    %123 = arith.negf %121 : vector<2x128xf32>
    %124 = math.exp %123 : vector<2x128xf32>
    %cst_24 = arith.constant 1.000000e+00 : f32
    %125 = vector.broadcast %cst_24 : f32 to vector<2x128xf32>
    %126 = arith.addf %125, %124 : vector<2x128xf32>
    %127 = arith.divf %125, %126 : vector<2x128xf32>
    %128 = arith.select %14, %122, %127 : vector<2x128xi1>, vector<2x128xf32>
    %129 = vector.extract_strided_slice %128 {offsets = [0, 0], sizes = [2, 32], strides = [1, 1]} : vector<2x128xf32> to vector<2x32xf32>
    %130 = vector.extract_strided_slice %128 {offsets = [0, 32], sizes = [2, 32], strides = [1, 1]} : vector<2x128xf32> to vector<2x32xf32>
    %131 = vector.extract_strided_slice %128 {offsets = [0, 64], sizes = [2, 32], strides = [1, 1]} : vector<2x128xf32> to vector<2x32xf32>
    %132 = vector.extract_strided_slice %128 {offsets = [0, 96], sizes = [2, 32], strides = [1, 1]} : vector<2x128xf32> to vector<2x32xf32>
    %133 = arith.mulf %130, %116 : vector<2x32xf32>
    %134 = arith.mulf %129, %131 : vector<2x32xf32>
    %135 = arith.addf %133, %134 : vector<2x32xf32>
    %136 = math.tanh %135 : vector<2x32xf32>
    %137 = arith.mulf %132, %136 : vector<2x32xf32>
    %cst_25 = arith.constant dense<0.000000e+00> : vector<2x128xf32>
    %138 = tpu.matmul %137, %0, %cst_25 {dimension_numbers = #tpu.dot_dimension_numbers<[1], [0], [0], [1], [0, 0, 1, 1], [], []>} : vector<2x32xf32>, vector<32x128xf32>, vector<2x128xf32> -> vector<2x128xf32>
    %139 = vector.extract_strided_slice %8 {offsets = [12, 0], sizes = [2, 128], strides = [1, 1]} : vector<18x128xf32> to vector<2x128xf32>
    %140 = arith.addf %138, %139 : vector<2x128xf32>
    %141 = math.tanh %140 : vector<2x128xf32>
    %142 = arith.negf %140 : vector<2x128xf32>
    %143 = math.exp %142 : vector<2x128xf32>
    %cst_26 = arith.constant 1.000000e+00 : f32
    %144 = vector.broadcast %cst_26 : f32 to vector<2x128xf32>
    %145 = arith.addf %144, %143 : vector<2x128xf32>
    %146 = arith.divf %144, %145 : vector<2x128xf32>
    %147 = arith.select %14, %141, %146 : vector<2x128xi1>, vector<2x128xf32>
    %148 = vector.extract_strided_slice %147 {offsets = [0, 0], sizes = [2, 32], strides = [1, 1]} : vector<2x128xf32> to vector<2x32xf32>
    %149 = vector.extract_strided_slice %147 {offsets = [0, 32], sizes = [2, 32], strides = [1, 1]} : vector<2x128xf32> to vector<2x32xf32>
    %150 = vector.extract_strided_slice %147 {offsets = [0, 64], sizes = [2, 32], strides = [1, 1]} : vector<2x128xf32> to vector<2x32xf32>
    %151 = vector.extract_strided_slice %147 {offsets = [0, 96], sizes = [2, 32], strides = [1, 1]} : vector<2x128xf32> to vector<2x32xf32>
    %152 = arith.mulf %149, %135 : vector<2x32xf32>
    %153 = arith.mulf %148, %150 : vector<2x32xf32>
    %154 = arith.addf %152, %153 : vector<2x32xf32>
    %155 = math.tanh %154 : vector<2x32xf32>
    %156 = arith.mulf %151, %155 : vector<2x32xf32>
    %cst_27 = arith.constant dense<0.000000e+00> : vector<2x128xf32>
    %157 = tpu.matmul %156, %0, %cst_27 {dimension_numbers = #tpu.dot_dimension_numbers<[1], [0], [0], [1], [0, 0, 1, 1], [], []>} : vector<2x32xf32>, vector<32x128xf32>, vector<2x128xf32> -> vector<2x128xf32>
    %158 = vector.extract_strided_slice %8 {offsets = [14, 0], sizes = [2, 128], strides = [1, 1]} : vector<18x128xf32> to vector<2x128xf32>
    %159 = arith.addf %157, %158 : vector<2x128xf32>
    %160 = math.tanh %159 : vector<2x128xf32>
    %161 = arith.negf %159 : vector<2x128xf32>
    %162 = math.exp %161 : vector<2x128xf32>
    %cst_28 = arith.constant 1.000000e+00 : f32
    %163 = vector.broadcast %cst_28 : f32 to vector<2x128xf32>
    %164 = arith.addf %163, %162 : vector<2x128xf32>
    %165 = arith.divf %163, %164 : vector<2x128xf32>
    %166 = arith.select %14, %160, %165 : vector<2x128xi1>, vector<2x128xf32>
    %167 = vector.extract_strided_slice %166 {offsets = [0, 0], sizes = [2, 32], strides = [1, 1]} : vector<2x128xf32> to vector<2x32xf32>
    %168 = vector.extract_strided_slice %166 {offsets = [0, 32], sizes = [2, 32], strides = [1, 1]} : vector<2x128xf32> to vector<2x32xf32>
    %169 = vector.extract_strided_slice %166 {offsets = [0, 64], sizes = [2, 32], strides = [1, 1]} : vector<2x128xf32> to vector<2x32xf32>
    %170 = vector.extract_strided_slice %166 {offsets = [0, 96], sizes = [2, 32], strides = [1, 1]} : vector<2x128xf32> to vector<2x32xf32>
    %171 = arith.mulf %168, %154 : vector<2x32xf32>
    %172 = arith.mulf %167, %169 : vector<2x32xf32>
    %173 = arith.addf %171, %172 : vector<2x32xf32>
    %174 = math.tanh %173 : vector<2x32xf32>
    %175 = arith.mulf %170, %174 : vector<2x32xf32>
    %cst_29 = arith.constant dense<0.000000e+00> : vector<2x128xf32>
    %176 = tpu.matmul %175, %0, %cst_29 {dimension_numbers = #tpu.dot_dimension_numbers<[1], [0], [0], [1], [0, 0, 1, 1], [], []>} : vector<2x32xf32>, vector<32x128xf32>, vector<2x128xf32> -> vector<2x128xf32>
    %177 = vector.extract_strided_slice %8 {offsets = [16, 0], sizes = [2, 128], strides = [1, 1]} : vector<18x128xf32> to vector<2x128xf32>
    %178 = arith.addf %176, %177 : vector<2x128xf32>
    %179 = math.tanh %178 : vector<2x128xf32>
    %180 = arith.negf %178 : vector<2x128xf32>
    %181 = math.exp %180 : vector<2x128xf32>
    %cst_30 = arith.constant 1.000000e+00 : f32
    %182 = vector.broadcast %cst_30 : f32 to vector<2x128xf32>
    %183 = arith.addf %182, %181 : vector<2x128xf32>
    %184 = arith.divf %182, %183 : vector<2x128xf32>
    %185 = arith.select %14, %179, %184 : vector<2x128xi1>, vector<2x128xf32>
    %186 = vector.extract_strided_slice %185 {offsets = [0, 0], sizes = [2, 32], strides = [1, 1]} : vector<2x128xf32> to vector<2x32xf32>
    %187 = vector.extract_strided_slice %185 {offsets = [0, 32], sizes = [2, 32], strides = [1, 1]} : vector<2x128xf32> to vector<2x32xf32>
    %188 = vector.extract_strided_slice %185 {offsets = [0, 64], sizes = [2, 32], strides = [1, 1]} : vector<2x128xf32> to vector<2x32xf32>
    %189 = vector.extract_strided_slice %185 {offsets = [0, 96], sizes = [2, 32], strides = [1, 1]} : vector<2x128xf32> to vector<2x32xf32>
    %190 = arith.mulf %187, %173 : vector<2x32xf32>
    %191 = arith.mulf %186, %188 : vector<2x32xf32>
    %192 = arith.addf %190, %191 : vector<2x32xf32>
    %193 = math.tanh %192 : vector<2x32xf32>
    %194 = arith.mulf %189, %193 : vector<2x32xf32>
    %195 = vector.extract_strided_slice %194 {offsets = [0, 16], sizes = [2, 16], strides = [1, 1]} : vector<2x32xf32> to vector<2x16xf32>
    %cst_31 = arith.constant dense<0.000000e+00> : vector<2x2xf32>
    %196 = tpu.matmul %195, %1, %cst_31 {dimension_numbers = #tpu.dot_dimension_numbers<[1], [0], [0], [1], [0, 0, 1, 1], [], []>} : vector<2x16xf32>, vector<16x2xf32>, vector<2x2xf32> -> vector<2x2xf32>
    %197 = vector.broadcast %2 : vector<1x2xf32> to vector<2x2xf32>
    %198 = arith.addf %196, %197 : vector<2x2xf32>
    %c0_32 = arith.constant 0 : index
    %c0_33 = arith.constant 0 : index
    %199 = vector.load %arg6[%c0_32, %c0_33] : memref<2x2xf32, #tpu.memory_space<vmem>>, vector<2x2xf32>
    tpu.vector_store %arg6[%c0_32, %c0_33], %198 {strides = array<i32>} : memref<2x2xf32, #tpu.memory_space<vmem>>, vector<2x2xf32>,
    return
  }
}

</mosaic_0001>

<bundles_post_ra>
// kernel: tpu_custom_call.1
= control target key start
LH: loop header
LB: loop body
LE: loop exit
PB: predicated region body
PF: predicated region fallthrough
CT: control target
= control target key end

     0   :  { %11 = vsyncpa [#allocation3], 0  ;;  %s1966_s0 = inlined_call_operand.hbm [shape: f32[18,63], index: 0, kind: input, shape index: {}]   ;;  %s1967_s1 = inlined_call_operand.hbm [shape: f32[63,128], index: 1, kind: input, shape index: {}]   ;;  %s1968_s2 = inlined_call_operand.hbm [shape: f32[32,128], index: 2, kind: input, shape index: {}]   ;;  %s1969_s3 = inlined_call_operand.vmem [shape: f32[1,128], index: 3, kind: input, shape index: {}]   ;;  %s1970_s4 = inlined_call_operand.vmem [shape: f32[16,2], index: 4, kind: input, shape index: {}]   ;;  %s1971_s5 = inlined_call_operand.vmem [shape: f32[1,2], index: 5, kind: input, shape index: {}]   ;;  %s1972_s6 = inlined_call_operand.hbm [shape: f32[2,2], index: 6, kind: output, shape index: {}]  }
   0x1   :  { %12 = vsyncpa [#allocation6], 0 }
   0x2   :  { %13 = vsyncpa [#allocation4], 0  ;;  %s1682_s21 = smov [#allocation5]   ;;  %s1683_s23 = smov [#allocation2]  }
   0x3   :  { %s31_s22 = sshll.u32 %s1682_s21, 4  ;;  %s19_s24 = sshll.u32 %s1683_s23, 4  ;;  %s32_s22 = int_to_ptr.vmem [resolvable:$true] %s31_s22  ;;  %s1731_s24 = int_to_ptr.vmem [resolvable:$true] %s19_s24 }
   0x4   :  { %s1588_s27 = scalar_lea.hbm %s1967_s1, 1024 }
   0x5   :  { %p1589_p0 = scmp.ne.s32.totalorder %s1967_s1, %s1588_s27  ;;  %p1592_p1 = scmp.lt.u32.totalorder %s1588_s27, %s1967_s1 }
   0x7   :  { %p1594_p2 = pnand %p1592_p1, %p1589_p0 }
   0x9   :  { %1597 = shalt.err (!%p1594_p2)
}
   0xa   :  { %s1598_s8 = scalar_lea.vmem %s32_s22, 1024  ;;  %p1603_p4 = scmp.lt.s32.totalorder %s32_s22, %s32_s22 }
   0xb   :  { %p1599_p3 = scmp.ne.s32.totalorder %s32_s22, %s1598_s8  ;;  %p1604_p5 = scmp.lt.s32.totalorder %s1598_s8, %s1598_s8 }
   0xd   :  { %p1605_p6 = por %p1604_p5, %p1603_p4 }
   0xf   :  { %p1606_p7 = pnand %p1605_p6, %p1599_p3 }
  0x11   :  { %1609 = shalt.err (!%p1606_p7)
}
  0x12   :  { %s1684_s9 = smov 128   ;;  %s1685_s10 = smov 8  }
  0x13   :  { %37 = dma.hbm_to_vmem [thread:$0]  %s1967_s1, 1024, %s32_s22, [#allocation6], %s1684_s9, %s1684_s9, %s1685_s10  }
  0x14   :  { %s1610_s15 = scalar_lea.hbm %s1966_s0, 384 }
  0x15   :  { %p1611_p8 = scmp.ne.s32.totalorder %s1966_s0, %s1610_s15  ;;  %p1614_p9 = scmp.lt.u32.totalorder %s1610_s15, %s1966_s0 }
  0x17   :  { %p1616_p10 = pnand %p1614_p9, %p1611_p8 }
  0x19   :  { %1619 = shalt.err (!%p1616_p10)
}
  0x1a   :  { %s1620_s20 = scalar_lea.vmem %s1731_s24, 384  ;;  %p1625_p12 = scmp.lt.s32.totalorder %s1731_s24, %s1731_s24 }
  0x1b   :  { %p1621_p11 = scmp.ne.s32.totalorder %s1731_s24, %s1620_s20  ;;  %p1626_p13 = scmp.lt.s32.totalorder %s1620_s20, %s1620_s20 }
  0x1d   :  { %p1627_p0 = por %p1626_p13, %p1625_p12 }
  0x1f   :  { %p1628_p1 = pnand %p1627_p0, %p1621_p11 }
  0x21   :  { %1631 = shalt.err (!%p1628_p1)
}
  0x22   :  { %25 = dma.hbm_to_vmem [thread:$0]  %s1966_s0, 384, %s1731_s24, [#allocation3], %s1684_s9, %s1684_s9, %s1685_s10  }
  0x23   :  { %s1686_s22 = smov [#allocation7]   ;;  %s1632_s27 = scalar_lea.hbm %s1968_s2, 512 }
  0x24   :  { %s43_s23 = sshll.u32 %s1686_s22, 4  ;;  %p1633_p2 = scmp.ne.s32.totalorder %s1968_s2, %s1632_s27  ;;  %s44_s23 = int_to_ptr.vmem [resolvable:$true] %s43_s23 }
  0x25   :  { %p1636_p3 = scmp.lt.u32.totalorder %s1632_s27, %s1968_s2 }
  0x27   :  { %p1638_p4 = pnand %p1636_p3, %p1633_p2 }
  0x29   :  { %1641 = shalt.err (!%p1638_p4)
}
  0x2a   :  { %s1642_s8 = scalar_lea.vmem %s44_s23, 512  ;;  %p1647_p6 = scmp.lt.s32.totalorder %s44_s23, %s44_s23 }
  0x2b   :  { %p1643_p5 = scmp.ne.s32.totalorder %s44_s23, %s1642_s8  ;;  %p1648_p7 = scmp.lt.s32.totalorder %s1642_s8, %s1642_s8 }
  0x2d   :  { %p1649_p8 = por %p1648_p7, %p1647_p6 }
  0x2f   :  { %p1650_p9 = pnand %p1649_p8, %p1643_p5 }
  0x31   :  { %1653 = shalt.err (!%p1650_p9)
}
  0x32   :  { %49 = dma.hbm_to_vmem [thread:$0]  %s1968_s2, 512, %s44_s23, [#allocation6], %s1684_s9, %s1684_s9, %s1685_s10  }
  0x33   :  { %1676 = dma.done.wait [#allocation3], 384  }
  0x34   :  { %1677 = vsyncadd [#allocation3], 4294966912 }
  0x35   :  { %1678 = dma.done.wait [#allocation6], 1536  }
  0x36   :  { %1679 = vsyncadd [#allocation6], 4294965760  ;;  %v1687_v0 = vmov 0.0|0.0   ;;  %vm1688_vm0 = vmmov 0   ;;  %v1689_v1 = vmov 0.0   ;;  %v75_v2 = vld [vmem:[#allocation5] sm:$0xff]  ;;  %v184_v30 = vlaneseq }
  0x37   :  { %1429 = vmatprep.subr.bf16.mxu0 %v1687_v0  ;;  %1442 = vmatprep.subr.bf16.mxu1 %v1687_v0  ;;  %v76_v3 = vld [vmem:[#allocation5 + $0x8] sm:$0xff]  ;;  %v77_v4 = vld [vmem:[#allocation5 + $0x10] sm:$0xff]  ;;  %v78_v6 = vld [vmem:[#allocation5 + $0x18] sm:$0xff]  ;;  %vm100_vm1 = vcmask 1046528   ;;  %vm1690_vm2 = vmmov 1   ;;  %vm90_vm4 = vcmask 515072  }
  0x38   :  { %1314 = vmatprep.mubr.msk.f32.mxu0 %vm1688_vm0, %v1689_v1  ;;  %1331 = vmatprep.mubr.msk.f32.mxu1 %vm1688_vm0, %v1689_v1  ;;  %v1430_v5 = vpack.c.bf16 %v76_v3, %v75_v2  ;;  %v65_v7 = vld [vmem:[#allocation7] sm:$0xff]  ;;  %v66_v8 = vld [vmem:[#allocation7 + $0x8] sm:$0xff]  ;;  %v1433_v9 = vpack.c.bf16 %v78_v6, %v77_v4  ;;  %v67_v11 = vld [vmem:[#allocation7 + $0x10] sm:$0xff]  ;;  %v185_v32 = vand.u32 127, %v184_v30  ;;  %s1692_s10 = smov 32   ;;  %s1693_s11 = smov 96  }
  0x39   :  { %v1789_v10 = vpack.c.bf16 %v66_v8, %v65_v7  ;;  %v68_v12 = vld [vmem:[#allocation7 + $0x18] sm:$0xff]  ;;  %v79_v13 = vld [vmem:[#allocation5 + $0x20] sm:$0xff]  ;;  %v80_v14 = vld [vmem:[#allocation5 + $0x28] sm:$0xff]  ;;  %vm192_vm9 = vcmask 261120   ;;  %s1694_s16 = smov 16   ;;  %vm1123_vm10 = vcmask 130048  }
  0x3a   :  { %1431 = vmatpush3.bf16.msra.mxu0 %v1430_v5  ;;  %v1793_v15 = vpack.c.bf16 %v68_v12, %v67_v11  ;;  %v1436_v16 = vpack.c.bf16 %v80_v14, %v79_v13  ;;  %v81_v17 = vld [vmem:[#allocation5 + $0x30] sm:$0xff]  ;;  %v82_v18 = vld [vmem:[#allocation5 + $0x38] sm:$0x7f]  ;;  %vm1440_vm3 = vmpackc.low %vm100_vm1, %vm1690_vm2  ;;  %vm186_vm5 = vcmp.ge.s32.totalorder %v185_v32, 64  ;;  %vm187_vm6 = vcmp.lt.s32.totalorder %v185_v32, 96  ;;  %s1695_s19 = smov [#allocation8]  }
  0x3b   :  { %1432 = vmatprep.subr.bf16.mxu0 %v1687_v0  ;;  %1444 = vmatpush3.bf16.msra.mxu1 %v1789_v10  ;;  %v1439_v19 = vpack.c.bf16 %v82_v18, %v81_v17  ;;  %v72_v20 = vld [vmem:[#allocation2] sm:$0xff]  ;;  %vm1824_vm7 = vmand %vm186_vm5, %vm187_vm6  ;;  %vm189_vm8 = vcmp.lt.s32.totalorder %v185_v32, 16  ;;  %s1204_s20 = sshll.u32 %s1695_s19, 4  ;;  %vm1196_vm11 = vcmask 9216   ;;  %s1205_s20 = int_to_ptr.vmem [resolvable:$true] %s1204_s20 }
  0x3c   :  { %1445 = vmatprep.subr.bf16.mxu1 %v1687_v0  ;;  %v1818_v23 = vld [vmem:[%s1969_s3] ss:$0 sm:$0xff]  ;;  %s1691_s3 = smov 64   ;;  %v1219_v43 = vsel %vm189_vm8, 1.0, %v1689_v1  ;;  %p1659_p11 = scmp.lt.s32.totalorder %s1205_s20, %s1205_s20 }
  0x3e   :  { %1434 = vmatpush3.bf16.msra.mxu0 %v1433_v9 }
  0x3f   :  { %1435 = vmatprep.subr.bf16.mxu0 %v1687_v0  ;;  %1447 = vmatpush3.bf16.msra.mxu1 %v1793_v15 }
  0x40   :  { %1448 = vmatprep.subr.bf16.mxu1 %v1687_v0 }
  0x42   :  { %1437 = vmatpush3.bf16.msra.mxu0 %v1436_v16  ;;  %1332 = vmatmul.mubr.f32.vlgmr.msra.gmra.mrb[0].mxu1 %v1689_v1 }
  0x43   :  { %1438 = vmatprep.subr.bf16.mxu0 %v1687_v0  ;;  %1450 = vmatpush3.bf16.msra.mxu1 %v1789_v10 }
  0x44   :  { %1342 = vmatprep.mubr.msk.f32.mxu1 %vm1688_vm0, %v1689_v1  ;;  %1451 = vmatprep.subr.bf16.mxu1 %v1687_v0 }
  0x46   :  { %1441 = vmatpush3.bf16.msk.msra.mxu0 %vm1440_vm3, %v1439_v19 }
  0x47   :  { %1460 = vmatprep.subr.bf16.mxu0 %v1687_v0  ;;  %1453 = vmatpush3.bf16.msra.mxu1 %v1793_v15 }
  0x48   :  { %1454 = vmatprep.subr.bf16.mxu1 %v1687_v0 }
  0x49   :  { %1315 = vmatmul.mubr.msk.f32.vlgmr.msra.gmra.mrb[0].mxu0 %vm90_vm4, %v72_v20 }
  0x4a   :  { %1462 = vmatpush3.bf16.msra.mxu0 %v1789_v10  ;;  %1317 = vmatprep.mubr.msk.f32.mxu0 %vm1688_vm0, %v1689_v1 }
  0x4b   :  { %1463 = vmatprep.subr.bf16.mxu0 %v1687_v0 }
  0x4e   :  { %1465 = vmatpush3.bf16.msra.mxu0 %v1793_v15 }
  0x4f   :  { %1472 = vmatprep.subr.bf16.mxu0 %v1687_v0 }
 0x115   :  { %v262_v21 = vpop.f32.mrb[0].mxu1 }
 0x116   :  { %v1333_v22 = vpop.f32.mrb[1].mxu1 }
 0x11c   :  { %v170_v24 = vpop.f32.mrb[0].mxu0 }
 0x11d   :  { %v1821_v25 = vadd.f32 %v1818_v23, %v170_v24  ;;  %v1316_v26 = vpop.f32.mrb[1].mxu0 }
 0x11f   :  { %v263_v27 = vadd.f32 %v262_v21, %v1821_v25  ;;  %v304_v49 = vrot.slane %v1821_v25, 2  ;;  %v406_v8 = vrot.slane %v1821_v25, 4 }
 0x121   :  { %v1220_v28 = vmul.f32 -1.442695, %v263_v27 }
 0x123   :  { %1516 = vpow2.f32 %v1220_v28  ;;  %v74_v28 = vld [vmem:[#allocation2 + $0x10] sm:$0x3] }
 0x124   :  { %1518 = vtanh.f32 %v263_v27  ;;  %v73_v27 = vld [vmem:[#allocation2 + $0x8] sm:$0xff] }
 0x125   :  { %1318 = vmatmul.mubr.msk.f32.gmra.mrb[2].mxu0 %vm90_vm4, %v73_v27 }
 0x126   :  { %1320 = vmatprep.mubr.msk.f32.mxu0 %vm1688_vm0, %v1689_v1 }
 0x129   :  { %1321 = vmatmul.mubr.msk.f32.gmra.mrb[4].mxu0 %vm90_vm4, %v74_v28 }
 0x12a   :  { %1364 = vmatprep.mubr.msk.f32.mxu0 %vm1688_vm0, %v1689_v1 }
 0x12d   :  { %v1517_v29 = vpop.eup %1516 }
 0x12e   :  { %v270_v31 = vadd.f32 1.0, %v1517_v29  ;;  %v1519_v34 = vpop.eup %1518 }
 0x130   :  { %1520 = vrcp.f32 %v270_v31 }
 0x13a   :  { %v1521_v35 = vpop.eup %1520 }
 0x13b   :  { %v273_v36 = vsel %vm1824_vm7, %v1519_v34, %v1521_v35 }
 0x13c   :  { %276 = vrot.lane.b32.xlu0 %v273_v36, %s1691_s3  ;;  %v274_v39 = vmul.f32 0.0, %v273_v36 }
 0x1ae   :  { %v277_v37 = vpop.permute.xlu0 %276 }
 0x1af   :  { %v279_v38 = vmul.f32 %v277_v37, %v273_v36 }
 0x1b1   :  { %281 = vrot.lane.b32.xlu0 %v279_v38, %s1692_s10 }
 0x1f8   :  { %v175_v32 = vpop.f32.mrb[2].mxu0 }
 0x1f9   :  { %v1319_v34 = vpop.f32.mrb[3].mxu0 }
 0x223   :  { %v282_v40 = vpop.permute.xlu0 %281 }
 0x224   :  { %v284_v41 = vadd.f32 %v282_v40, %v274_v39 }
 0x226   :  { %1522 = vtanh.f32 %v284_v41 }
 0x230   :  { %v1523_v42 = vpop.eup %1522 }
 0x231   :  { %287 = vrot.lane.b32.xlu1 %v1523_v42, %s1691_s3 }
 0x235   :  { %292 = vrot.lane.b32.xlu1 %v1219_v43, %s1693_s11 }
 0x2a3   :  { %v288_v44 = vpop.permute.xlu1 %287 }
 0x2a4   :  { %v290_v45 = vmul.f32 %v288_v44, %v273_v36  ;;  %v508_v36 = vrot.slane %v1821_v25, 6 }
 0x2a7   :  { %v293_v46 = vpop.permute.xlu1 %292 }
 0x2a8   :  { %v295_v47 = vmul.f32 %v293_v46, %v290_v45 }
 0x2aa   :  { %301 = vrot.lane.b32.xlu0 %v295_v47, %s1692_s10 }
 0x2ae   :  { %296 = vrot.lane.b32.xlu0 %v1219_v43, %s1692_s10 }
 0x31c   :  { %v302_v48 = vpop.permute.xlu0 %301 }
 0x31d   :  { %1343 = vmatmul.mubr.msk.f32.vlgmr.msra.gmra.mrb[2].mxu1 %vm192_vm9, %v302_v48 }
 0x31e   :  { %1456 = vmatpush3.bf16.msra.mxu1 %v1789_v10  ;;  %1353 = vmatprep.mubr.msk.f32.mxu1 %vm1688_vm0, %v1689_v1 }
 0x31f   :  { %1457 = vmatprep.subr.bf16.mxu1 %v1687_v0 }
 0x320   :  { %v297_v61 = vpop.permute.xlu0 %296 }
 0x321   :  { %v299_v62 = vmul.f32 %v297_v61, %v284_v41 }
 0x322   :  { %1459 = vmatpush3.bf16.msra.mxu1 %v1793_v15 }
 0x323   :  { %1466 = vmatprep.subr.bf16.mxu1 %v1687_v0 }
 0x3f0   :  { %v374_v50 = vpop.f32.mrb[2].mxu1 }
 0x3f1   :  { %v375_v51 = vadd.f32 %v374_v50, %v304_v49  ;;  %v1344_v52 = vpop.f32.mrb[3].mxu1 }
 0x3f3   :  { %v1222_v53 = vmul.f32 -1.442695, %v375_v51 }
 0x3f5   :  { %1524 = vpow2.f32 %v1222_v53 }
 0x3f6   :  { %1526 = vtanh.f32 %v375_v51 }
 0x3ff   :  { %v1525_v54 = vpop.eup %1524 }
 0x400   :  { %v382_v55 = vadd.f32 1.0, %v1525_v54  ;;  %v1527_v56 = vpop.eup %1526  ;;  %v1892_v54 = vadd.f32 %v1818_v23, %v175_v32 }
 0x402   :  { %1528 = vrcp.f32 %v382_v55 }
 0x40c   :  { %v1529_v57 = vpop.eup %1528 }
 0x40d   :  { %v385_v58 = vsel %vm1824_vm7, %v1527_v56, %v1529_v57 }
 0x40e   :  { %388 = vrot.lane.b32.xlu1 %v385_v58, %s1691_s3  ;;  %v386_v63 = vmul.f32 %v385_v58, %v299_v62 }
 0x480   :  { %v389_v59 = vpop.permute.xlu1 %388 }
 0x481   :  { %v391_v60 = vmul.f32 %v389_v59, %v385_v58 }
 0x483   :  { %393 = vrot.lane.b32.xlu1 %v391_v60, %s1692_s10 }
 0x4f5   :  { %v394_v2 = vpop.permute.xlu1 %393 }
 0x4f6   :  { %v396_v3 = vadd.f32 %v394_v2, %v386_v63 }
 0x4f8   :  { %1530 = vtanh.f32 %v396_v3 }
 0x502   :  { %v1531_v4 = vpop.eup %1530 }
 0x503   :  { %399 = vrot.lane.b32.xlu0 %v1531_v4, %s1691_s3 }
 0x575   :  { %v400_v5 = vpop.permute.xlu0 %399 }
 0x576   :  { %v402_v6 = vmul.f32 %v400_v5, %v385_v58 }
 0x578   :  { %404 = vrot.lane.b32.xlu1 %v402_v6, %s1692_s10 }
 0x5ea   :  { %v405_v7 = vpop.permute.xlu1 %404 }
 0x5eb   :  { %1354 = vmatmul.mubr.msk.f32.vlgmr.msra.gmra.mrb[4].mxu1 %vm192_vm9, %v405_v7 }
 0x5ec   :  { %1468 = vmatpush3.bf16.msra.mxu1 %v1789_v10  ;;  %1375 = vmatprep.mubr.msk.f32.mxu1 %vm1688_vm0, %v1689_v1 }
 0x5ed   :  { %1469 = vmatprep.subr.bf16.mxu1 %v1687_v0 }
 0x5f0   :  { %1471 = vmatpush3.bf16.msra.mxu1 %v1793_v15 }
 0x5f1   :  { %1478 = vmatprep.subr.bf16.mxu1 %v1687_v0 }
 0x6be   :  { %v476_v9 = vpop.f32.mrb[4].mxu1 }
 0x6bf   :  { %v477_v11 = vadd.f32 %v476_v9, %v406_v8  ;;  %v1355_v12 = vpop.f32.mrb[5].mxu1 }
 0x6c0   :  { %v711_v12 = vrot.slane %v1892_v54, 2 }
 0x6c1   :  { %v1224_v13 = vmul.f32 -1.442695, %v477_v11 }
 0x6c3   :  { %1532 = vpow2.f32 %v1224_v13 }
 0x6c4   :  { %1534 = vtanh.f32 %v477_v11 }
 0x6cd   :  { %v1533_v14 = vpop.eup %1532 }
 0x6ce   :  { %v484_v16 = vadd.f32 1.0, %v1533_v14  ;;  %v1535_v17 = vpop.eup %1534 }
 0x6d0   :  { %1536 = vrcp.f32 %v484_v16 }
 0x6da   :  { %v1537_v18 = vpop.eup %1536 }
 0x6db   :  { %v487_v19 = vsel %vm1824_vm7, %v1535_v17, %v1537_v18 }
 0x6dc   :  { %490 = vrot.lane.b32.xlu0 %v487_v19, %s1691_s3  ;;  %v488_v22 = vmul.f32 %v487_v19, %v396_v3 }
 0x74e   :  { %v491_v20 = vpop.permute.xlu0 %490 }
 0x74f   :  { %v493_v21 = vmul.f32 %v491_v20, %v487_v19 }
 0x751   :  { %495 = vrot.lane.b32.xlu1 %v493_v21, %s1692_s10 }
 0x7c3   :  { %v496_v24 = vpop.permute.xlu1 %495 }
 0x7c4   :  { %v498_v26 = vadd.f32 %v496_v24, %v488_v22 }
 0x7c6   :  { %1538 = vtanh.f32 %v498_v26 }
 0x7d0   :  { %v1539_v29 = vpop.eup %1538 }
 0x7d1   :  { %501 = vrot.lane.b32.xlu0 %v1539_v29, %s1691_s3 }
 0x843   :  { %v502_v30 = vpop.permute.xlu0 %501 }
 0x844   :  { %v504_v31 = vmul.f32 %v502_v30, %v487_v19 }
 0x846   :  { %506 = vrot.lane.b32.xlu1 %v504_v31, %s1692_s10 }
 0x8b8   :  { %v507_v35 = vpop.permute.xlu1 %506 }
 0x8b9   :  { %1365 = vmatmul.mubr.msk.f32.vlgmr.msra.gmra.mrb[6].mxu0 %vm192_vm9, %v507_v35  ;;  %v813_v35 = vrot.slane %v1892_v54, 4 }
 0x8ba   :  { %1474 = vmatpush3.bf16.msra.mxu0 %v1789_v10  ;;  %1386 = vmatprep.mubr.msk.f32.mxu0 %vm1688_vm0, %v1689_v1 }
 0x8bb   :  { %1475 = vmatprep.subr.bf16.mxu0 %v1687_v0 }
 0x8be   :  { %1477 = vmatpush3.bf16.msra.mxu0 %v1793_v15 }
 0x8bf   :  { %1484 = vmatprep.subr.bf16.mxu0 %v1687_v0 }
 0x98c   :  { %v578_v37 = vpop.f32.mrb[6].mxu0 }
 0x98d   :  { %v579_v38 = vadd.f32 %v578_v37, %v508_v36  ;;  %v1366_v39 = vpop.f32.mrb[7].mxu0 }
 0x98f   :  { %v1226_v40 = vmul.f32 -1.442695, %v579_v38 }
 0x991   :  { %1540 = vpow2.f32 %v1226_v40 }
 0x992   :  { %1542 = vtanh.f32 %v579_v38 }
 0x99b   :  { %v1541_v41 = vpop.eup %1540 }
 0x99c   :  { %v586_v42 = vadd.f32 1.0, %v1541_v41  ;;  %v1543_v43 = vpop.eup %1542 }
 0x99e   :  { %1544 = vrcp.f32 %v586_v42 }
 0x9a8   :  { %v1545_v44 = vpop.eup %1544 }
 0x9a9   :  { %v589_v45 = vsel %vm1824_vm7, %v1543_v43, %v1545_v44 }
 0x9aa   :  { %592 = vrot.lane.b32.xlu0 %v589_v45, %s1691_s3  ;;  %v590_v25 = vmul.f32 %v589_v45, %v498_v26 }
 0xa1c   :  { %v593_v46 = vpop.permute.xlu0 %592 }
 0xa1d   :  { %v595_v47 = vmul.f32 %v593_v46, %v589_v45 }
 0xa1f   :  { %597 = vrot.lane.b32.xlu1 %v595_v47, %s1692_s10 }
 0xa91   :  { %v598_v48 = vpop.permute.xlu1 %597 }
 0xa92   :  { %v600_v49 = vadd.f32 %v598_v48, %v590_v25 }
 0xa94   :  { %1546 = vtanh.f32 %v600_v49 }
 0xa9e   :  { %v1547_v50 = vpop.eup %1546 }
 0xa9f   :  { %603 = vrot.lane.b32.xlu0 %v1547_v50, %s1691_s3 }
 0xb11   :  { %v604_v51 = vpop.permute.xlu0 %603 }
 0xb12   :  { %v606_v52 = vmul.f32 %v604_v51, %v589_v45 }
 0xb14   :  { %608 = vrot.lane.b32.xlu1 %v606_v52, %s1692_s10 }
 0xb86   :  { %v609_v53 = vpop.permute.xlu1 %608 }
 0xb87   :  { %1376 = vmatmul.mubr.msk.f32.vlgmr.msra.gmra.mrb[6].mxu1 %vm192_vm9, %v609_v53  ;;  %v915_v53 = vrot.slane %v1892_v54, 6 }
 0xb88   :  { %1480 = vmatpush3.bf16.msra.mxu1 %v1789_v10  ;;  %1397 = vmatprep.mubr.msk.f32.mxu1 %vm1688_vm0, %v1689_v1 }
 0xb89   :  { %1481 = vmatprep.subr.bf16.mxu1 %v1687_v0 }
 0xb8c   :  { %1483 = vmatpush3.bf16.msra.mxu1 %v1793_v15 }
 0xb8d   :  { %1496 = vmatprep.subr.bf16.mxu1 %v1687_v0 }
 0xc5a   :  { %v678_v55 = vpop.f32.mrb[6].mxu1 }
 0xc5b   :  { %v679_v56 = vadd.f32 %v678_v55, %v1892_v54  ;;  %v1377_v57 = vpop.f32.mrb[7].mxu1 }
 0xc5d   :  { %v1228_v58 = vmul.f32 -1.442695, %v679_v56 }
 0xc5f   :  { %1548 = vpow2.f32 %v1228_v58 }
 0xc60   :  { %1550 = vtanh.f32 %v679_v56 }
 0xc69   :  { %v1549_v59 = vpop.eup %1548 }
 0xc6a   :  { %v686_v60 = vadd.f32 1.0, %v1549_v59  ;;  %v1551_v61 = vpop.eup %1550 }
 0xc6c   :  { %1552 = vrcp.f32 %v686_v60 }
 0xc76   :  { %v1553_v62 = vpop.eup %1552 }
 0xc77   :  { %v689_v63 = vsel %vm1824_vm7, %v1551_v61, %v1553_v62 }
 0xc78   :  { %692 = vrot.lane.b32.xlu0 %v689_v63, %s1691_s3  ;;  %v690_v4 = vmul.f32 %v689_v63, %v600_v49 }
 0xcea   :  { %v693_v2 = vpop.permute.xlu0 %692 }
 0xceb   :  { %v695_v3 = vmul.f32 %v693_v2, %v689_v63 }
 0xced   :  { %697 = vrot.lane.b32.xlu1 %v695_v3, %s1692_s10 }
 0xd5f   :  { %v698_v5 = vpop.permute.xlu1 %697 }
 0xd60   :  { %v700_v6 = vadd.f32 %v698_v5, %v690_v4 }
 0xd62   :  { %1554 = vtanh.f32 %v700_v6 }
 0xd6c   :  { %v1555_v7 = vpop.eup %1554 }
 0xd6d   :  { %703 = vrot.lane.b32.xlu0 %v1555_v7, %s1691_s3 }
 0xddf   :  { %v704_v8 = vpop.permute.xlu0 %703 }
 0xde0   :  { %v706_v9 = vmul.f32 %v704_v8, %v689_v63 }
 0xde2   :  { %708 = vrot.lane.b32.xlu1 %v706_v9, %s1692_s10 }
 0xe54   :  { %v709_v11 = vpop.permute.xlu1 %708 }
 0xe55   :  { %1387 = vmatmul.mubr.msk.f32.vlgmr.msra.gmra.mrb[8].mxu0 %vm192_vm9, %v709_v11 }
 0xe56   :  { %1486 = vmatpush3.bf16.msra.mxu0 %v1789_v10  ;;  %1408 = vmatprep.mubr.msk.f32.mxu0 %vm1688_vm0, %v1689_v1 }
 0xe57   :  { %1487 = vmatprep.subr.bf16.mxu0 %v1687_v0 }
 0xe5a   :  { %1489 = vmatpush3.bf16.msra.mxu0 %v1793_v15 }
 0xe5b   :  { %1490 = vmatprep.subr.bf16.mxu0 %v1687_v0 }
 0xf28   :  { %v781_v13 = vpop.f32.mrb[8].mxu0 }
 0xf29   :  { %v782_v14 = vadd.f32 %v781_v13, %v711_v12  ;;  %v1388_v16 = vpop.f32.mrb[9].mxu0 }
 0xf2b   :  { %v1230_v17 = vmul.f32 -1.442695, %v782_v14 }
 0xf2d   :  { %1556 = vpow2.f32 %v1230_v17 }
 0xf2e   :  { %1558 = vtanh.f32 %v782_v14 }
 0xf37   :  { %v1557_v18 = vpop.eup %1556 }
 0xf38   :  { %v789_v19 = vadd.f32 1.0, %v1557_v18  ;;  %v1559_v20 = vpop.eup %1558 }
 0xf3a   :  { %1560 = vrcp.f32 %v789_v19 }
 0xf44   :  { %v1561_v21 = vpop.eup %1560 }
 0xf45   :  { %v792_v22 = vsel %vm1824_vm7, %v1559_v20, %v1561_v21  ;;  %v69_v21 = vld [vmem:[%s1970_s4] sm:$0xff] }
 0xf46   :  { %795 = vrot.lane.b32.xlu0 %v792_v22, %s1691_s3  ;;  %v793_v27 = vmul.f32 %v792_v22, %v700_v6 }
 0xfb8   :  { %v796_v24 = vpop.permute.xlu0 %795 }
 0xfb9   :  { %v798_v26 = vmul.f32 %v796_v24, %v792_v22 }
 0xfbb   :  { %800 = vrot.lane.b32.xlu1 %v798_v26, %s1692_s10 }
0x102d   :  { %v801_v28 = vpop.permute.xlu1 %800 }
0x102e   :  { %v803_v29 = vadd.f32 %v801_v28, %v793_v27 }
0x1030   :  { %1562 = vtanh.f32 %v803_v29 }
0x103a   :  { %v1563_v30 = vpop.eup %1562 }
0x103b   :  { %806 = vrot.lane.b32.xlu0 %v1563_v30, %s1691_s3 }
0x10ad   :  { %v807_v31 = vpop.permute.xlu0 %806 }
0x10ae   :  { %v809_v32 = vmul.f32 %v807_v31, %v792_v22  ;;  %v70_v22 = vld [vmem:[%s1970_s4 + $0x8] sm:$0xff]  ;;  %s1654_s4 = scalar_lea.vmem %s1205_s20, 32 }
0x10af   :  { %v1497_v33 = vpack.c.bf16 %v70_v22, %v69_v21  ;;  %p1655_p10 = scmp.ne.s32.totalorder %s1205_s20, %s1654_s4  ;;  %p1660_p12 = scmp.lt.s32.totalorder %s1654_s4, %s1654_s4 }
0x10b0   :  { %811 = vrot.lane.b32.xlu1 %v809_v32, %s1692_s10 }
0x10b1   :  { %p1661_p13 = por %p1660_p12, %p1659_p11 }
0x10b3   :  { %p1662_p0 = pnand %p1661_p13, %p1655_p10 }
0x1122   :  { %v812_v34 = vpop.permute.xlu1 %811 }
0x1123   :  { %1398 = vmatmul.mubr.msk.f32.vlgmr.msra.gmra.mrb[8].mxu1 %vm192_vm9, %v812_v34 }
0x1124   :  { %1426 = vmatprep.mubr.msk.f32.mxu1 %vm1688_vm0, %v1689_v1  ;;  %1498 = vmatpush3.bf16.msra.mxu1 %v1497_v33 }
0x11f6   :  { %v883_v36 = vpop.f32.mrb[8].mxu1 }
0x11f7   :  { %v884_v37 = vadd.f32 %v883_v36, %v813_v35  ;;  %v1399_v38 = vpop.f32.mrb[9].mxu1 }
0x11f9   :  { %v1232_v39 = vmul.f32 -1.442695, %v884_v37 }
0x11fb   :  { %1564 = vpow2.f32 %v1232_v39 }
0x11fc   :  { %1566 = vtanh.f32 %v884_v37 }
0x1205   :  { %v1565_v40 = vpop.eup %1564 }
0x1206   :  { %v891_v41 = vadd.f32 1.0, %v1565_v40  ;;  %v1567_v42 = vpop.eup %1566 }
0x1208   :  { %1568 = vrcp.f32 %v891_v41 }
0x1212   :  { %v1569_v43 = vpop.eup %1568 }
0x1213   :  { %v894_v44 = vsel %vm1824_vm7, %v1567_v42, %v1569_v43 }
0x1214   :  { %897 = vrot.lane.b32.xlu0 %v894_v44, %s1691_s3  ;;  %v895_v47 = vmul.f32 %v894_v44, %v803_v29  ;;  %v1237_v29 = vld [vmem:[%s1971_s5] ss:$0 sm:$0xff] }
0x1286   :  { %v898_v45 = vpop.permute.xlu0 %897 }
0x1287   :  { %v900_v46 = vmul.f32 %v898_v45, %v894_v44 }
0x1289   :  { %902 = vrot.lane.b32.xlu1 %v900_v46, %s1692_s10 }
0x12fb   :  { %v903_v25 = vpop.permute.xlu1 %902 }
0x12fc   :  { %v905_v48 = vadd.f32 %v903_v25, %v895_v47 }
0x12fe   :  { %1570 = vtanh.f32 %v905_v48 }
0x1308   :  { %v1571_v49 = vpop.eup %1570 }
0x1309   :  { %908 = vrot.lane.b32.xlu0 %v1571_v49, %s1691_s3 }
0x137b   :  { %v909_v50 = vpop.permute.xlu0 %908 }
0x137c   :  { %v911_v51 = vmul.f32 %v909_v50, %v894_v44 }
0x137e   :  { %913 = vrot.lane.b32.xlu1 %v911_v51, %s1692_s10 }
0x13f0   :  { %v914_v52 = vpop.permute.xlu1 %913 }
0x13f1   :  { %1409 = vmatmul.mubr.msk.f32.vlgmr.msra.gmra.mrb[10].mxu0 %vm192_vm9, %v914_v52 }
0x13f2   :  { %1492 = vmatpush3.bf16.msra.mxu0 %v1789_v10  ;;  %1419 = vmatprep.mubr.msk.f32.mxu0 %vm1688_vm0, %v1689_v1 }
0x13f3   :  { %1493 = vmatprep.subr.bf16.mxu0 %v1687_v0 }
0x13f6   :  { %1495 = vmatpush3.bf16.msra.mxu0 %v1793_v15 }
0x14c4   :  { %v985_v55 = vpop.f32.mrb[10].mxu0 }
0x14c5   :  { %v986_v56 = vadd.f32 %v985_v55, %v915_v53  ;;  %v1410_v57 = vpop.f32.mrb[11].mxu0 }
0x14c7   :  { %v1234_v58 = vmul.f32 -1.442695, %v986_v56 }
0x14c9   :  { %1572 = vpow2.f32 %v1234_v58 }
0x14ca   :  { %1574 = vtanh.f32 %v986_v56 }
0x14d3   :  { %v1573_v59 = vpop.eup %1572 }
0x14d4   :  { %v993_v60 = vadd.f32 1.0, %v1573_v59  ;;  %v1575_v61 = vpop.eup %1574 }
0x14d6   :  { %1576 = vrcp.f32 %v993_v60 }
0x14e0   :  { %v1577_v10 = vpop.eup %1576 }
0x14e1   :  { %v996_v1 = vsel %vm1824_vm7, %v1575_v61, %v1577_v10 }
0x14e2   :  { %999 = vrot.lane.b32.xlu0 %v996_v1, %s1691_s3  ;;  %v997_v54 = vmul.f32 %v996_v1, %v905_v48 }
0x1554   :  { %v1000_v0 = vpop.permute.xlu0 %999 }
0x1555   :  { %v1002_v15 = vmul.f32 %v1000_v0, %v996_v1 }
0x1557   :  { %1004 = vrot.lane.b32.xlu1 %v1002_v15, %s1692_s10 }
0x15c9   :  { %v1005_v62 = vpop.permute.xlu1 %1004 }
0x15ca   :  { %v1007_v63 = vadd.f32 %v1005_v62, %v997_v54 }
0x15cc   :  { %1578 = vtanh.f32 %v1007_v63 }
0x15d6   :  { %v1579_v2 = vpop.eup %1578 }
0x15d7   :  { %1010 = vrot.lane.b32.xlu0 %v1579_v2, %s1691_s3 }
0x1649   :  { %v1011_v3 = vpop.permute.xlu0 %1010 }
0x164a   :  { %v1013_v4 = vmul.f32 %v1011_v3, %v996_v1 }
0x164c   :  { %1015 = vrot.lane.b32.xlu1 %v1013_v4, %s1692_s10 }
0x16be   :  { %v1016_v5 = vpop.permute.xlu1 %1015 }
0x16bf   :  { %1420 = vmatmul.mubr.msk.f32.vlgmr.msra.gmra.mrb[4].mxu0 %vm192_vm9, %v1016_v5 }
0x1792   :  { %v1085_v6 = vpop.f32.mrb[4].mxu0 }
0x1793   :  { %v1499_v7 = vadd.f32 %v1818_v23, %v1085_v6  ;;  %v1421_v8 = vpop.f32.mrb[5].mxu0 }
0x1795   :  { %v1236_v9 = vmul.f32 -1.442695, %v1499_v7 }
0x1797   :  { %1580 = vpow2.f32 %v1236_v9 }
0x1798   :  { %1582 = vtanh.f32 %v1499_v7 }
0x17a1   :  { %v1581_v11 = vpop.eup %1580 }
0x17a2   :  { %v1093_v12 = vadd.f32 1.0, %v1581_v11  ;;  %v1583_v13 = vpop.eup %1582 }
0x17a4   :  { %1584 = vrcp.f32 %v1093_v12 }
0x17ae   :  { %v1585_v14 = vpop.eup %1584 }
0x17af   :  { %v1096_v16 = vsel %vm1824_vm7, %v1583_v13, %v1585_v14 }
0x17b0   :  { %1099 = vrot.lane.b32.xlu0 %v1096_v16, %s1691_s3  ;;  %v1097_v19 = vmul.f32 %v1096_v16, %v1007_v63 }
0x1822   :  { %v1100_v17 = vpop.permute.xlu0 %1099 }
0x1823   :  { %v1102_v18 = vmul.f32 %v1100_v17, %v1096_v16 }
0x1825   :  { %1104 = vrot.lane.b32.xlu1 %v1102_v18, %s1692_s10 }
0x1897   :  { %v1105_v23 = vpop.permute.xlu1 %1104 }
0x1898   :  { %v1107_v20 = vadd.f32 %v1105_v23, %v1097_v19 }
0x189a   :  { %1586 = vtanh.f32 %v1107_v20 }
0x18a4   :  { %v1587_v24 = vpop.eup %1586 }
0x18a5   :  { %1110 = vrot.lane.b32.xlu0 %v1587_v24, %s1691_s3 }
0x1917   :  { %v1111_v26 = vpop.permute.xlu0 %1110 }
0x1918   :  { %v1113_v27 = vmul.f32 %v1111_v26, %v1096_v16 }
0x191a   :  { %1121 = vrot.lane.b32.xlu1 %v1113_v27, %s1694_s16 }
0x198c   :  { %v1122_v28 = vpop.permute.xlu1 %1121 }
0x198d   :  { %1427 = vmatmul.mubr.msk.f32.vlgmr.msra.gmra.mrb[10].mxu1 %vm1123_vm10, %v1122_v28 }
0x1a60   :  { %v1192_v30 = vpop.f32.mrb[10].mxu1 }
0x1a61   :  { %v1193_v31 = vadd.f32 %v1237_v29, %v1192_v30  ;;  %v1428_v32 = vpop.f32.mrb[11].mxu1 }
0x1a63   :  { %1197 = vst.msk [vmem:[#allocation8] sm:$0x3] %vm1196_vm11, %v1193_v31 }
0x1a64   :  { %1665 = shalt.err (!%p1662_p0)
}
0x1a65   :  { %s1666_s22 = scalar_lea.hbm %s1972_s6, 32 }
0x1a66   :  { %p1667_p1 = scmp.ne.s32.totalorder %s1972_s6, %s1666_s22  ;;  %p1670_p2 = scmp.lt.u32.totalorder %s1666_s22, %s1972_s6 }
0x1a68   :  { %p1672_p3 = pnand %p1670_p2, %p1667_p1 }
0x1a6a   :  { %1675 = shalt.err (!%p1672_p3)
}
0x1a6b   :  { %1207 = dma.vmem_to_hbm [thread:$0]  %s1205_s20, 32, %s1972_s6, [#allocation4]  }
0x1a6c   :  { %1680 = dma.done.wait [#allocation4], 32  }
0x1a6d   :  { %1681 = vsyncadd [#allocation4], 4294967264 }
0x1a6e   :  { %1211 = vsyncpa [#allocation3], 1 }
0x1a6f   :  { %1212 = vsyncpa [#allocation6], 1 }
0x1a70   :  { %1213 = vsyncpa [#allocation4], 1 }

</bundles_post_ra>
